<compile_context>
chip_gen: v7x
topology: tpu7x:2x2x1
jax: 0.10.0
libtpu: 0.0.40
codegen_flags: <defaults>
</compile_context>

<pallas_src>
import functools

import jax
import jax.numpy as jnp
from jax import lax
from jax.experimental import pallas as pl
from jax.experimental.pallas import tpu as pltpu

EPS = 1e-5
NEG_PAD = -1e30          # fills padded logit columns so they vanish in softmax
HID = 128                # lane-padded hidden width for all layers
NVEC = 8                 # sublane rows reserved for the vector params


def _bn_relu_fused(h, gamma, beta):
    """One-pass training-mode BatchNorm1d + ReLU.

    s and s2 are independent sublane reductions; per-element work is a single
    multiply-add with precomputed scale/shift."""
    inv_b = 1.0 / h.shape[0]
    s = jnp.sum(h, axis=0, keepdims=True)
    s2 = jnp.sum(h * h, axis=0, keepdims=True)
    mean = s * inv_b
    var = jnp.maximum(s2 * inv_b - mean * mean, 0.0)
    scale = gamma * lax.rsqrt(var + EPS)
    shift = beta - mean * scale
    return jnp.maximum(h * scale + shift, 0.0)


def modelc_kernel(x_ref, p_ref, out_ref, *, kp):
    # Static, sublane-aligned views into the packed parameter blob (zero cost).
    g0 = p_ref[pl.ds(0, 1), :]                    # gamma0 (padded with 1)
    be0 = p_ref[pl.ds(1, 1), :]                   # beta0  (padded with 0)
    g1 = p_ref[pl.ds(2, 1), :]
    be1 = p_ref[pl.ds(3, 1), :]
    b2 = p_ref[pl.ds(4, 1), :]                    # fc2 bias (padded with NEG_PAD)

    w0 = p_ref[pl.ds(NVEC, kp), :]                # (kp, 128)  real (image_size, 100)
    w1 = p_ref[pl.ds(NVEC + kp, HID), :]          # (128, 128) real (100, 50)
    w2 = p_ref[pl.ds(NVEC + kp + HID, HID), :]    # (128, 128) real (50, 10)

    x = x_ref[...]                                # (B, kp)

    # fc0 -> bn0 -> relu   (fc0 bias cancelled exactly by BN mean subtraction)
    h = jnp.dot(x, w0, preferred_element_type=jnp.float32)
    h = _bn_relu_fused(h, g0, be0)

    # fc1 -> bn1 -> relu   (fc1 bias likewise cancelled)
    h = jnp.dot(h, w1, preferred_element_type=jnp.float32)
    h = _bn_relu_fused(h, g1, be1)

    # fc2 -> log_softmax along features. Padded logit columns equal NEG_PAD,
    # so exp() underflows to 0 and they do not perturb max / lse.
    logits = jnp.dot(h, w2, preferred_element_type=jnp.float32) + b2
    m = jnp.max(logits, axis=1, keepdims=True)
    shifted = logits - m
    lse = jnp.log(jnp.sum(jnp.exp(shifted), axis=1, keepdims=True))
    out_ref[...] = shifted - lse


@functools.partial(jax.jit, static_argnames=("image_size", "kp"))
def modelc_forward(x, pblob, *, image_size, kp):
    """x: any shape whose trailing dims flatten to image_size (NCHW ok)."""
    x2d = x.reshape(-1, image_size).astype(jnp.float32)   # x.view(-1, image_size)
    if kp != image_size:                                   # sublane-align K if needed
        x2d = jnp.pad(x2d, ((0, 0), (0, kp - image_size)))
    batch = x2d.shape[0]

    vmem = pl.BlockSpec(memory_space=pltpu.MemorySpace.VMEM)
    out_pad = pl.pallas_call(
        functools.partial(modelc_kernel, kp=kp),
        out_shape=jax.ShapeDtypeStruct((batch, HID), jnp.float32),
        in_specs=[vmem, vmem],
        out_specs=vmem,
    )(x2d, pblob)
    return out_pad[:, :10]                                 # drop lane padding


def init_params(key, image_size):
    """PyTorch-default-style init: Linear U(-1/sqrt(fan_in), 1/sqrt(fan_in));
    BatchNorm gamma=1, beta=0. Weights stored as (in_features, out_features)."""
    dims = [(image_size, 100), (100, 50), (50, 10)]
    keys = jax.random.split(key, 2 * len(dims))
    params = {}
    for i, (fan_in, fan_out) in enumerate(dims):
        bound = 1.0 / jnp.sqrt(jnp.float32(fan_in))
        params[f"w{i}"] = jax.random.uniform(
            keys[2 * i], (fan_in, fan_out), jnp.float32, -bound, bound)
        params[f"b{i}"] = jax.random.uniform(
            keys[2 * i + 1], (1, fan_out), jnp.float32, -bound, bound)
    params["g0"] = jnp.ones((1, 100), jnp.float32)
    params["be0"] = jnp.zeros((1, 100), jnp.float32)
    params["g1"] = jnp.ones((1, 50), jnp.float32)
    params["be1"] = jnp.zeros((1, 50), jnp.float32)
    return params


def pack_params(params, image_size):
    """One-time host-side packing into a single lane-dense parameter blob."""
    kp = ((image_size + 7) // 8) * 8       # sublane-aligned K for clean slicing

    vec = jnp.zeros((NVEC, HID), jnp.float32)
    vec = vec.at[0, :].set(1.0).at[0, :100].set(params["g0"].reshape(-1))
    vec = vec.at[1, :100].set(params["be0"].reshape(-1))
    vec = vec.at[2, :].set(1.0).at[2, :50].set(params["g1"].reshape(-1))
    vec = vec.at[3, :50].set(params["be1"].reshape(-1))
    vec = vec.at[4, :].set(NEG_PAD).at[4, :10].set(params["b2"].reshape(-1))

    w0 = jnp.zeros((kp, HID), jnp.float32).at[:image_size, :100].set(params["w0"])
    w1 = jnp.zeros((HID, HID), jnp.float32).at[:100, :50].set(params["w1"])
    w2 = jnp.zeros((HID, HID), jnp.float32).at[:50, :10].set(params["w2"])

    pblob = jnp.concatenate([vec, w0, w1, w2], axis=0)     # (8+kp+256, 128)
    return pblob, kp


def reference_forward(x, params):
    """Pure-JAX reference with full PyTorch semantics (incl. fc biases)."""
    def bn(h, gamma, beta):
        mean = jnp.mean(h, axis=0, keepdims=True)
        var = jnp.mean((h - mean) ** 2, axis=0, keepdims=True)
        return (h - mean) * lax.rsqrt(var + EPS) * gamma + beta

    image_size = params["w0"].shape[0]
    h = x.reshape(-1, image_size).astype(jnp.float32)
    h = h @ params["w0"] + params["b0"]
    h = jnp.maximum(bn(h, params["g0"], params["be0"]), 0.0)
    h = h @ params["w1"] + params["b1"]
    h = jnp.maximum(bn(h, params["g1"], params["be1"]), 0.0)
    logits = h @ params["w2"] + params["b2"]
    return jax.nn.log_softmax(logits, axis=1)


if __name__ == "__main__":
    key = jax.random.PRNGKey(0)
    k_x, k_p = jax.random.split(key)

    batch, channels, height, width = 8, 1, 8, 8
    image_size = channels * height * width          # 64

    x = jax.random.normal(k_x, (batch, channels, height, width), jnp.float32)
    params = init_params(k_p, image_size)
    pblob, kp = pack_params(params, image_size)

    out = modelc_forward(x, pblob, image_size=image_size, kp=kp)
    out = jax.block_until_ready(out)

    ref = reference_forward(x, params)
    assert out.shape == (batch, 10)
    assert jnp.allclose(out, ref, atol=1e-4, rtol=1e-4), "mismatch vs reference"
    # log_softmax rows should sum to ~1 after exp
    assert jnp.allclose(jnp.sum(jnp.exp(out), axis=1), 1.0, atol=1e-4)

    print("KERNEL_OK")
</pallas_src>

<mosaic_0001>
module attributes {stable_mosaic.version = 11 : i64} {
  func.func @modelc_kernel(%arg0: memref<8x64xf32, #tpu.memory_space<vmem>>, %arg1: memref<328x128xf32, #tpu.memory_space<vmem>>, %arg2: memref<8x128xf32, #tpu.memory_space<vmem>>) attributes {dimension_semantics = [], scalar_prefetch = 0 : i64, scratch_operands = 0 : i64, tpu.core_type = #tpu.core_type<tc>} {
    %c0 = arith.constant 0 : index
    %c0_0 = arith.constant 0 : index
    %0 = vector.load %arg1[%c0, %c0_0] : memref<328x128xf32, #tpu.memory_space<vmem>>, vector<1x128xf32>
    %c1 = arith.constant 1 : index
    %c0_1 = arith.constant 0 : index
    %1 = vector.load %arg1[%c1, %c0_1] : memref<328x128xf32, #tpu.memory_space<vmem>>, vector<1x128xf32>
    %c2 = arith.constant 2 : index
    %c0_2 = arith.constant 0 : index
    %2 = vector.load %arg1[%c2, %c0_2] : memref<328x128xf32, #tpu.memory_space<vmem>>, vector<1x128xf32>
    %c3 = arith.constant 3 : index
    %c0_3 = arith.constant 0 : index
    %3 = vector.load %arg1[%c3, %c0_3] : memref<328x128xf32, #tpu.memory_space<vmem>>, vector<1x128xf32>
    %c4 = arith.constant 4 : index
    %c0_4 = arith.constant 0 : index
    %4 = vector.load %arg1[%c4, %c0_4] : memref<328x128xf32, #tpu.memory_space<vmem>>, vector<1x128xf32>
    %c8 = arith.constant 8 : index
    %c0_5 = arith.constant 0 : index
    %5 = vector.load %arg1[%c8, %c0_5] : memref<328x128xf32, #tpu.memory_space<vmem>>, vector<64x128xf32>
    %c72 = arith.constant 72 : index
    %c0_6 = arith.constant 0 : index
    %6 = vector.load %arg1[%c72, %c0_6] : memref<328x128xf32, #tpu.memory_space<vmem>>, vector<128x128xf32>
    %c200 = arith.constant 200 : index
    %c0_7 = arith.constant 0 : index
    %7 = vector.load %arg1[%c200, %c0_7] : memref<328x128xf32, #tpu.memory_space<vmem>>, vector<128x128xf32>
    %c0_8 = arith.constant 0 : index
    %c0_9 = arith.constant 0 : index
    %8 = vector.load %arg0[%c0_8, %c0_9] : memref<8x64xf32, #tpu.memory_space<vmem>>, vector<8x64xf32>
    %cst = arith.constant dense<0.000000e+00> : vector<8x128xf32>
    %9 = tpu.matmul %8, %5, %cst {dimension_numbers = #tpu.dot_dimension_numbers<[1], [0], [0], [1], [0, 0, 1, 1], [], []>} : vector<8x64xf32>, vector<64x128xf32>, vector<8x128xf32> -> vector<8x128xf32>
    %cst_10 = arith.constant dense<0.000000e+00> : vector<128xf32>
    %10 = vector.multi_reduction <add>, %9, %cst_10 [0] : vector<8x128xf32> to vector<128xf32>
    %11 = vector.shape_cast %10 : vector<128xf32> to vector<1x128xf32>
    %12 = arith.mulf %9, %9 : vector<8x128xf32>
    %cst_11 = arith.constant dense<0.000000e+00> : vector<128xf32>
    %13 = vector.multi_reduction <add>, %12, %cst_11 [0] : vector<8x128xf32> to vector<128xf32>
    %14 = vector.shape_cast %13 : vector<128xf32> to vector<1x128xf32>
    %cst_12 = arith.constant 1.250000e-01 : f32
    %15 = vector.broadcast %cst_12 : f32 to vector<1x128xf32>
    %16 = arith.mulf %11, %15 : vector<1x128xf32>
    %cst_13 = arith.constant 1.250000e-01 : f32
    %17 = vector.broadcast %cst_13 : f32 to vector<1x128xf32>
    %18 = arith.mulf %14, %17 : vector<1x128xf32>
    %19 = arith.mulf %16, %16 : vector<1x128xf32>
    %20 = arith.subf %18, %19 : vector<1x128xf32>
    %cst_14 = arith.constant 0.000000e+00 : f32
    %21 = vector.broadcast %cst_14 : f32 to vector<1x128xf32>
    %22 = arith.maximumf %20, %21 : vector<1x128xf32>
    %cst_15 = arith.constant 9.99999974E-6 : f32
    %23 = vector.broadcast %cst_15 : f32 to vector<1x128xf32>
    %24 = arith.addf %22, %23 : vector<1x128xf32>
    %25 = math.rsqrt %24 : vector<1x128xf32>
    %26 = arith.mulf %0, %25 : vector<1x128xf32>
    %27 = arith.mulf %16, %26 : vector<1x128xf32>
    %28 = arith.subf %1, %27 : vector<1x128xf32>
    %29 = vector.broadcast %26 : vector<1x128xf32> to vector<8x128xf32>
    %30 = arith.mulf %9, %29 : vector<8x128xf32>
    %31 = vector.broadcast %28 : vector<1x128xf32> to vector<8x128xf32>
    %32 = arith.addf %30, %31 : vector<8x128xf32>
    %cst_16 = arith.constant 0.000000e+00 : f32
    %33 = vector.broadcast %cst_16 : f32 to vector<8x128xf32>
    %34 = arith.maximumf %32, %33 : vector<8x128xf32>
    %cst_17 = arith.constant dense<0.000000e+00> : vector<8x128xf32>
    %35 = tpu.matmul %34, %6, %cst_17 {dimension_numbers = #tpu.dot_dimension_numbers<[1], [0], [0], [1], [0, 0, 1, 1], [], []>} : vector<8x128xf32>, vector<128x128xf32>, vector<8x128xf32> -> vector<8x128xf32>
    %cst_18 = arith.constant dense<0.000000e+00> : vector<128xf32>
    %36 = vector.multi_reduction <add>, %35, %cst_18 [0] : vector<8x128xf32> to vector<128xf32>
    %37 = vector.shape_cast %36 : vector<128xf32> to vector<1x128xf32>
    %38 = arith.mulf %35, %35 : vector<8x128xf32>
    %cst_19 = arith.constant dense<0.000000e+00> : vector<128xf32>
    %39 = vector.multi_reduction <add>, %38, %cst_19 [0] : vector<8x128xf32> to vector<128xf32>
    %40 = vector.shape_cast %39 : vector<128xf32> to vector<1x128xf32>
    %cst_20 = arith.constant 1.250000e-01 : f32
    %41 = vector.broadcast %cst_20 : f32 to vector<1x128xf32>
    %42 = arith.mulf %37, %41 : vector<1x128xf32>
    %cst_21 = arith.constant 1.250000e-01 : f32
    %43 = vector.broadcast %cst_21 : f32 to vector<1x128xf32>
    %44 = arith.mulf %40, %43 : vector<1x128xf32>
    %45 = arith.mulf %42, %42 : vector<1x128xf32>
    %46 = arith.subf %44, %45 : vector<1x128xf32>
    %cst_22 = arith.constant 0.000000e+00 : f32
    %47 = vector.broadcast %cst_22 : f32 to vector<1x128xf32>
    %48 = arith.maximumf %46, %47 : vector<1x128xf32>
    %cst_23 = arith.constant 9.99999974E-6 : f32
    %49 = vector.broadcast %cst_23 : f32 to vector<1x128xf32>
    %50 = arith.addf %48, %49 : vector<1x128xf32>
    %51 = math.rsqrt %50 : vector<1x128xf32>
    %52 = arith.mulf %2, %51 : vector<1x128xf32>
    %53 = arith.mulf %42, %52 : vector<1x128xf32>
    %54 = arith.subf %3, %53 : vector<1x128xf32>
    %55 = vector.broadcast %52 : vector<1x128xf32> to vector<8x128xf32>
    %56 = arith.mulf %35, %55 : vector<8x128xf32>
    %57 = vector.broadcast %54 : vector<1x128xf32> to vector<8x128xf32>
    %58 = arith.addf %56, %57 : vector<8x128xf32>
    %cst_24 = arith.constant 0.000000e+00 : f32
    %59 = vector.broadcast %cst_24 : f32 to vector<8x128xf32>
    %60 = arith.maximumf %58, %59 : vector<8x128xf32>
    %cst_25 = arith.constant dense<0.000000e+00> : vector<8x128xf32>
    %61 = tpu.matmul %60, %7, %cst_25 {dimension_numbers = #tpu.dot_dimension_numbers<[1], [0], [0], [1], [0, 0, 1, 1], [], []>} : vector<8x128xf32>, vector<128x128xf32>, vector<8x128xf32> -> vector<8x128xf32>
    %62 = vector.broadcast %4 : vector<1x128xf32> to vector<8x128xf32>
    %63 = arith.addf %61, %62 : vector<8x128xf32>
    %cst_26 = arith.constant dense<0xFF800000> : vector<8xf32>
    %64 = vector.multi_reduction <maximumf>, %63, %cst_26 [1] : vector<8x128xf32> to vector<8xf32>
    %65 = vector.shape_cast %64 : vector<8xf32> to vector<8x1xf32>
    %66 = vector.broadcast %65 : vector<8x1xf32> to vector<8x128xf32>
    %67 = arith.subf %63, %66 : vector<8x128xf32>
    %68 = math.exp %67 : vector<8x128xf32>
    %cst_27 = arith.constant dense<0.000000e+00> : vector<8xf32>
    %69 = vector.multi_reduction <add>, %68, %cst_27 [1] : vector<8x128xf32> to vector<8xf32>
    %70 = vector.shape_cast %69 : vector<8xf32> to vector<8x1xf32>
    %71 = math.log %70 : vector<8x1xf32>
    %72 = vector.broadcast %71 : vector<8x1xf32> to vector<8x128xf32>
    %73 = arith.subf %67, %72 : vector<8x128xf32>
    %c0_28 = arith.constant 0 : index
    %c0_29 = arith.constant 0 : index
    %74 = vector.load %arg2[%c0_28, %c0_29] : memref<8x128xf32, #tpu.memory_space<vmem>>, vector<8x128xf32>
    tpu.vector_store %arg2[%c0_28, %c0_29], %73 {strides = array<i32>} : memref<8x128xf32, #tpu.memory_space<vmem>>, vector<8x128xf32>,
    return
  }
}

</mosaic_0001>

<bundles_post_ra>
// kernel: modelc_forward.1
= control target key start
LH: loop header
LB: loop body
LE: loop exit
PB: predicated region body
PF: predicated region fallthrough
CT: control target
= control target key end

     0   :  { %7 = vsyncpa [#allocation3], 0  ;;  %s719_s0 = inlined_call_operand.vmem [shape: f32[8,64], index: 0, kind: input, shape index: {}]   ;;  %s720_s1 = inlined_call_operand.hbm [shape: f32[328,128], index: 1, kind: input, shape index: {}]   ;;  %s721_s2 = inlined_call_operand.hbm [shape: f32[8,128], index: 2, kind: output, shape index: {}]  }
   0x1   :  { %8 = vsyncpa [#allocation4], 0  ;;  %s641_s9 = smov [#allocation2]   ;;  %s593_s13 = scalar_lea.hbm %s720_s1, 5248 }
   0x2   :  { %s16_s10 = sshll.u32 %s641_s9, 4  ;;  %p594_p0 = scmp.ne.s32.totalorder %s720_s1, %s593_s13  ;;  %s17_s10 = int_to_ptr.vmem [resolvable:$true] %s16_s10 }
   0x3   :  { %p597_p1 = scmp.lt.u32.totalorder %s593_s13, %s720_s1 }
   0x5   :  { %p599_p2 = pnand %p597_p1, %p594_p0 }
   0x7   :  { %602 = shalt.err (!%p599_p2)
}
   0x8   :  { %s603_s18 = scalar_lea.vmem %s17_s10, 5248  ;;  %p608_p4 = scmp.lt.s32.totalorder %s17_s10, %s17_s10 }
   0x9   :  { %p604_p3 = scmp.ne.s32.totalorder %s17_s10, %s603_s18  ;;  %p609_p5 = scmp.lt.s32.totalorder %s603_s18, %s603_s18 }
   0xb   :  { %p610_p6 = por %p609_p5, %p608_p4 }
   0xd   :  { %p611_p7 = pnand %p610_p6, %p604_p3 }
   0xf   :  { %614 = shalt.err (!%p611_p7)
}
  0x10   :  { %s642_s19 = smov 128   ;;  %s643_s20 = smov 8  }
  0x11   :  { %22 = dma.hbm_to_vmem [thread:$0]  %s720_s1, 5248, %s17_s10, [#allocation3], %s642_s19, %s642_s19, %s643_s20  }
  0x12   :  { %637 = dma.done.wait [#allocation3], 5248  }
  0x13   :  { %638 = vsyncadd [#allocation3], 4294962048  ;;  %v644_v0 = vmov 0.0|0.0   ;;  %vm645_vm0 = vmmov 0   ;;  %v646_v1 = vmov 0.0   ;;  %v31_v2 = vld [vmem:[#allocation2 + $0x8] sm:$0xff]  ;;  %v169_v60 = vlaneseq }
  0x14   :  { %518 = vmatprep.subr.bf16.mxu0 %v644_v0  ;;  %445 = vmatprep.mubr.msk.f32.mxu0 %vm645_vm0, %v646_v1  ;;  %v32_v3 = vld [vmem:[#allocation2 + $0x10] sm:$0xff]  ;;  %v33_v4 = vld [vmem:[#allocation2 + $0x18] sm:$0xff]  ;;  %v34_v6 = vld [vmem:[#allocation2 + $0x20] sm:$0xff]  ;;  %vm72_vm1 = vcmask 523264  }
  0x15   :  { %530 = vmatprep.subr.bf16.mxu1 %v644_v0  ;;  %480 = vmatprep.mubr.msk.f32.mxu1 %vm645_vm0, %v646_v1  ;;  %v519_v5 = vpack.c.bf16 %v32_v3, %v31_v2  ;;  %v522_v7 = vpack.c.bf16 %v34_v6, %v33_v4  ;;  %v35_v8 = vld [vmem:[#allocation2 + $0x28] sm:$0xff]  ;;  %v36_v9 = vld [vmem:[#allocation2 + $0x30] sm:$0xff]  ;;  %v37_v11 = vld [vmem:[#allocation2 + $0x38] sm:$0xff]  ;;  %v170_v61 = vshrl.u32 %v169_v60, 7 }
  0x16   :  { %v525_v10 = vpack.c.bf16 %v36_v9, %v35_v8  ;;  %v38_v12 = vld [vmem:[#allocation2 + $0x40] sm:$0xff]  ;;  %v39_v15 = vld [vmem:[#allocation2 + $0x48] sm:$0xff]  ;;  %v40_v16 = vld [vmem:[#allocation2 + $0x50] sm:$0xff] }
  0x17   :  { %520 = vmatpush3.bf16.msra.mxu0 %v519_v5  ;;  %v528_v13 = vpack.c.bf16 %v38_v12, %v37_v11  ;;  %v71_v14 = vld [vmem:[%s719_s0] sm:$0xff]  ;;  %v531_v17 = vpack.c.bf16 %v40_v16, %v39_v15  ;;  %v41_v18 = vld [vmem:[#allocation2 + $0x58] sm:$0xff]  ;;  %v43_v21 = vld [vmem:[#allocation2 + $0x68] sm:$0xff]  ;;  %v694_v63 = vsub.s32 0, %v170_v61  ;;  %s647_s0 = smov [#allocation5]  }
  0x18   :  { %521 = vmatprep.subr.bf16.mxu0 %v644_v0  ;;  %v42_v19 = vld [vmem:[#allocation2 + $0x60] sm:$0xff]  ;;  %v44_v22 = vld [vmem:[#allocation2 + $0x70] sm:$0xff]  ;;  %v45_v24 = vld [vmem:[#allocation2 + $0x78] sm:$0xff]  ;;  %s375_s24 = sshll.u32 %s647_s0, 4  ;;  %s376_s24 = int_to_ptr.vmem [resolvable:$true] %s375_s24 }
  0x19   :  { %532 = vmatpush3.bf16.msra.mxu1 %v531_v17  ;;  %v534_v20 = vpack.c.bf16 %v42_v19, %v41_v18  ;;  %v537_v23 = vpack.c.bf16 %v44_v22, %v43_v21  ;;  %v46_v25 = vld [vmem:[#allocation2 + $0x80] sm:$0xff]  ;;  %v47_v27 = vld [vmem:[#allocation2 + $0x88] sm:$0xff]  ;;  %v48_v28 = vld [vmem:[#allocation2 + $0x90] sm:$0xff]  ;;  %s615_s25 = scalar_lea.vmem %s376_s24, 128  ;;  %p620_p9 = scmp.lt.s32.totalorder %s376_s24, %s376_s24 }
  0x1a   :  { %533 = vmatprep.subr.bf16.mxu1 %v644_v0  ;;  %v540_v26 = vpack.c.bf16 %v46_v25, %v45_v24  ;;  %v543_v29 = vpack.c.bf16 %v48_v28, %v47_v27  ;;  %v49_v30 = vld [vmem:[#allocation2 + $0x98] sm:$0xff]  ;;  %v50_v31 = vld [vmem:[#allocation2 + $0xa0] sm:$0xff]  ;;  %v51_v33 = vld [vmem:[#allocation2 + $0xa8] sm:$0xff]  ;;  %p616_p8 = scmp.ne.s32.totalorder %s376_s24, %s615_s25  ;;  %p621_p10 = scmp.lt.s32.totalorder %s615_s25, %s615_s25 }
  0x1b   :  { %523 = vmatpush3.bf16.msra.mxu0 %v522_v7  ;;  %v546_v32 = vpack.c.bf16 %v50_v31, %v49_v30  ;;  %v52_v34 = vld [vmem:[#allocation2 + $0xb0] sm:$0xff]  ;;  %v53_v36 = vld [vmem:[#allocation2 + $0xb8] sm:$0xff]  ;;  %v54_v37 = vld [vmem:[#allocation2 + $0xc0] sm:$0xff] }
  0x1c   :  { %524 = vmatprep.subr.bf16.mxu0 %v644_v0  ;;  %v549_v35 = vpack.c.bf16 %v52_v34, %v51_v33  ;;  %v552_v38 = vpack.c.bf16 %v54_v37, %v53_v36  ;;  %v26_v62 = vld [vmem:[#allocation2] sm:$0x1]  ;;  %v27_v3 = vld [vmem:[#allocation2 + $0x1] sm:$0x1]  ;;  %v55_v11 = vld [vmem:[#allocation2 + $0xc8] sm:$0xff]  ;;  %p622_p11 = por %p621_p10, %p620_p9 }
  0x1d   :  { %535 = vmatpush3.bf16.msra.mxu1 %v534_v20  ;;  %v56_v12 = vld [vmem:[#allocation2 + $0xd0] sm:$0xff]  ;;  %v58_v15 = vld [vmem:[#allocation2 + $0xe0] sm:$0xff]  ;;  %v59_v17 = vld [vmem:[#allocation2 + $0xe8] sm:$0xff] }
  0x1e   :  { %536 = vmatprep.subr.bf16.mxu1 %v644_v0  ;;  %v60_v18 = vld [vmem:[#allocation2 + $0xf0] sm:$0xff]  ;;  %v61_v20 = vld [vmem:[#allocation2 + $0xf8] sm:$0xff]  ;;  %v62_v21 = vld [vmem:[#allocation2 + $0x100] sm:$0xff]  ;;  %p623_p12 = pnand %p622_p11, %p616_p8 }
  0x1f   :  { %526 = vmatpush3.bf16.msra.mxu0 %v525_v10  ;;  %v561_v19 = vpack.c.bf16 %v60_v18, %v59_v17  ;;  %v564_v22 = vpack.c.bf16 %v62_v21, %v61_v20  ;;  %v64_v24 = vld [vmem:[#allocation2 + $0x110] sm:$0xff]  ;;  %v66_v27 = vld [vmem:[#allocation2 + $0x120] sm:$0xff] }
  0x20   :  { %527 = vmatprep.subr.bf16.mxu0 %v644_v0  ;;  %v68_v30 = vld [vmem:[#allocation2 + $0x130] sm:$0xff]  ;;  %v70_v33 = vld [vmem:[#allocation2 + $0x140] sm:$0xff] }
  0x21   :  { %538 = vmatpush3.bf16.msra.mxu1 %v537_v23  ;;  %v63_v23 = vld [vmem:[#allocation2 + $0x108] sm:$0xff] }
  0x22   :  { %539 = vmatprep.subr.bf16.mxu1 %v644_v0  ;;  %v567_v25 = vpack.c.bf16 %v64_v24, %v63_v23 }
  0x23   :  { %529 = vmatpush3.bf16.msra.mxu0 %v528_v13  ;;  %v555_v13 = vpack.c.bf16 %v56_v12, %v55_v11 }
  0x24   :  { %554 = vmatprep.subr.bf16.mxu0 %v644_v0 }
  0x25   :  { %541 = vmatpush3.bf16.msra.mxu1 %v540_v26  ;;  %v65_v26 = vld [vmem:[#allocation2 + $0x118] sm:$0xff] }
  0x26   :  { %446 = vmatmul.mubr.msk.f32.vlgmr.msra.gmra.mrb[0].mxu0 %vm72_vm1, %v71_v14  ;;  %542 = vmatprep.subr.bf16.mxu1 %v644_v0  ;;  %v57_v14 = vld [vmem:[#allocation2 + $0xd8] sm:$0xff]  ;;  %v570_v28 = vpack.c.bf16 %v66_v27, %v65_v26 }
  0x27   :  { %515 = vmatprep.mubr.msk.f32.mxu0 %vm645_vm0, %v646_v1  ;;  %556 = vmatpush3.bf16.msra.mxu0 %v555_v13  ;;  %v558_v16 = vpack.c.bf16 %v58_v15, %v57_v14 }
  0x28   :  { %557 = vmatprep.subr.bf16.mxu0 %v644_v0 }
  0x29   :  { %544 = vmatpush3.bf16.msra.mxu1 %v543_v29  ;;  %v67_v29 = vld [vmem:[#allocation2 + $0x128] sm:$0xff] }
  0x2a   :  { %545 = vmatprep.subr.bf16.mxu1 %v644_v0  ;;  %v573_v31 = vpack.c.bf16 %v68_v30, %v67_v29 }
  0x2b   :  { %559 = vmatpush3.bf16.msra.mxu0 %v558_v16 }
  0x2c   :  { %560 = vmatprep.subr.bf16.mxu0 %v644_v0 }
  0x2d   :  { %547 = vmatpush3.bf16.msra.mxu1 %v546_v32  ;;  %v69_v32 = vld [vmem:[#allocation2 + $0x138] sm:$0xff] }
  0x2e   :  { %548 = vmatprep.subr.bf16.mxu1 %v644_v0  ;;  %v576_v34 = vpack.c.bf16 %v70_v33, %v69_v32 }
  0x2f   :  { %562 = vmatpush3.bf16.msra.mxu0 %v561_v19 }
  0x30   :  { %563 = vmatprep.subr.bf16.mxu0 %v644_v0 }
  0x31   :  { %550 = vmatpush3.bf16.msra.mxu1 %v549_v35 }
  0x32   :  { %551 = vmatprep.subr.bf16.mxu1 %v644_v0 }
  0x33   :  { %565 = vmatpush3.bf16.msra.mxu0 %v564_v22 }
  0x34   :  { %566 = vmatprep.subr.bf16.mxu0 %v644_v0 }
  0x35   :  { %553 = vmatpush3.bf16.msra.mxu1 %v552_v38 }
  0x37   :  { %568 = vmatpush3.bf16.msra.mxu0 %v567_v25 }
  0x38   :  { %569 = vmatprep.subr.bf16.mxu0 %v644_v0 }
  0x3b   :  { %571 = vmatpush3.bf16.msra.mxu0 %v570_v28 }
  0x3c   :  { %572 = vmatprep.subr.bf16.mxu0 %v644_v0 }
  0x3f   :  { %574 = vmatpush3.bf16.msra.mxu0 %v573_v31 }
  0x40   :  { %575 = vmatprep.subr.bf16.mxu0 %v644_v0 }
  0x43   :  { %577 = vmatpush3.bf16.msra.mxu0 %v576_v34 }
  0xf9   :  { %v142_v39 = vpop.f32.mrb[0].mxu0 }
  0xfa   :  { %v146_v40 = vrot.slane %v142_v39, 4  ;;  %v152_v41 = vmul.f32 %v142_v39, %v142_v39  ;;  %v447_v42 = vpop.f32.mrb[1].mxu0 }
  0xfc   :  { %v147_v43 = vadd.f32 %v146_v40, %v142_v39  ;;  %v153_v44 = vrot.slane %v152_v41, 4 }
  0xfe   :  { %v148_v45 = vrot.slane %v147_v43, 2  ;;  %v154_v46 = vadd.f32 %v153_v44, %v152_v41 }
 0x100   :  { %v149_v47 = vadd.f32 %v148_v45, %v147_v43  ;;  %v155_v48 = vrot.slane %v154_v46, 2 }
 0x102   :  { %v150_v49 = vrot.slane %v149_v47, 1  ;;  %v156_v50 = vadd.f32 %v155_v48, %v154_v46 }
 0x104   :  { %v151_v51 = vadd.f32 %v150_v49, %v149_v47  ;;  %v157_v52 = vrot.slane %v156_v50, 1 }
 0x106   :  { %v158_v53 = vadd.f32 %v157_v52, %v156_v50  ;;  %v159_v54 = vmul.f32 0.125, %v151_v51 }
 0x108   :  { %v160_v55 = vmul.f32 0.125, %v158_v53  ;;  %v161_v56 = vmul.f32 %v159_v54, %v159_v54 }
 0x10a   :  { %v162_v57 = vsub.f32 %v160_v55, %v161_v56  ;;  %v28_v55 = vld [vmem:[#allocation2 + $0x2] sm:$0x1] }
 0x10c   :  { %v163_v58 = vmax.f32 %v162_v57, 0.0 }
 0x10e   :  { %v164_v59 = vadd.f32 1e-05, %v163_v58  ;;  %v29_v58 = vld [vmem:[#allocation2 + $0x3] sm:$0x1] }
 0x110   :  { %585 = vrsqrt.f32 %v164_v59 }
 0x11a   :  { %v586_v1 = vpop.eup %585 }
 0x11b   :  { %v166_v2 = vmul.f32 %v586_v1, %v26_v62 }
 0x11d   :  { %v172_v4 = vrot.slane %v166_v2, %v694_v63  ;;  %v167_v5 = vmul.f32 %v166_v2, %v159_v54 }
 0x11f   :  { %v168_v6 = vsub.f32 %v27_v3, %v167_v5  ;;  %v173_v7 = vmul.f32 %v172_v4, %v142_v39  ;;  %v385_v4 = vld [vmem:[#allocation2 + $0x4] ss:$0 sm:$0xff] }
 0x121   :  { %v177_v8 = vrot.slane %v168_v6, %v694_v63 }
 0x123   :  { %v178_v9 = vadd.f32 %v177_v8, %v173_v7 }
 0x125   :  { %v179_v10 = vmax.f32 %v178_v9, 0.0 }
 0x127   :  { %481 = vmatmul.mubr.f32.vlgmr.msra.gmra.mrb[0].mxu1 %v179_v10 }
 0x1fa   :  { %v246_v35 = vpop.f32.mrb[0].mxu1 }
 0x1fb   :  { %v250_v36 = vrot.slane %v246_v35, 4  ;;  %v256_v37 = vmul.f32 %v246_v35, %v246_v35  ;;  %v482_v38 = vpop.f32.mrb[1].mxu1 }
 0x1fd   :  { %v251_v39 = vadd.f32 %v250_v36, %v246_v35  ;;  %v257_v40 = vrot.slane %v256_v37, 4 }
 0x1ff   :  { %v252_v41 = vrot.slane %v251_v39, 2  ;;  %v258_v42 = vadd.f32 %v257_v40, %v256_v37 }
 0x201   :  { %v253_v43 = vadd.f32 %v252_v41, %v251_v39  ;;  %v259_v44 = vrot.slane %v258_v42, 2 }
 0x203   :  { %v254_v45 = vrot.slane %v253_v43, 1  ;;  %v260_v46 = vadd.f32 %v259_v44, %v258_v42 }
 0x205   :  { %v255_v47 = vadd.f32 %v254_v45, %v253_v43  ;;  %v261_v48 = vrot.slane %v260_v46, 1 }
 0x207   :  { %v262_v49 = vadd.f32 %v261_v48, %v260_v46  ;;  %v263_v0 = vmul.f32 0.125, %v255_v47 }
 0x209   :  { %v264_v50 = vmul.f32 0.125, %v262_v49  ;;  %v265_v51 = vmul.f32 %v263_v0, %v263_v0 }
 0x20b   :  { %v266_v52 = vsub.f32 %v264_v50, %v265_v51 }
 0x20d   :  { %v267_v53 = vmax.f32 %v266_v52, 0.0 }
 0x20f   :  { %v268_v54 = vadd.f32 1e-05, %v267_v53 }
 0x211   :  { %587 = vrsqrt.f32 %v268_v54 }
 0x21b   :  { %v588_v56 = vpop.eup %587 }
 0x21c   :  { %v270_v57 = vmul.f32 %v588_v56, %v28_v55 }
 0x21e   :  { %v271_v59 = vmul.f32 %v270_v57, %v263_v0  ;;  %v276_v60 = vrot.slane %v270_v57, %v694_v63 }
 0x220   :  { %v272_v61 = vsub.f32 %v29_v58, %v271_v59  ;;  %v277_v62 = vmul.f32 %v276_v60, %v246_v35 }
 0x222   :  { %v281_v1 = vrot.slane %v272_v61, %v694_v63 }
 0x224   :  { %v282_v2 = vadd.f32 %v281_v1, %v277_v62 }
 0x226   :  { %v283_v3 = vmax.f32 %v282_v2, 0.0 }
 0x228   :  { %516 = vmatmul.mubr.f32.vlgmr.msra.gmra.mrb[2].mxu0 %v283_v3 }
 0x2fb   :  { %v354_v5 = vpop.f32.mrb[2].mxu0 }
 0x2fc   :  { %v355_v6 = vadd.f32 %v385_v4, %v354_v5  ;;  %v517_v7 = vpop.f32.mrb[3].mxu0 }
 0x2fe   :  { %358 = vmax.xlane.f32.xlu0 %v355_v6 }
 0x38b   :  { %v359_v8 = vpop.xlane.xlu0 %358 }
 0x38c   :  { %v360_v9 = vsub.f32 %v355_v6, %v359_v8 }
 0x38e   :  { %v361_v10 = vmul.f32 1.442695, %v360_v9 }
 0x390   :  { %589 = vpow2.f32 %v361_v10 }
 0x39a   :  { %v590_v11 = vpop.eup %589 }
 0x39b   :  { %363 = vadd.xlane.f32.xlu0 %v590_v11 }
 0x428   :  { %v364_v12 = vpop.xlane.xlu0 %363 }
 0x429   :  { %591 = vlog2.f32 %v364_v12 }
 0x433   :  { %v592_v13 = vpop.eup %591 }
 0x434   :  { %v366_v63 = vmul.f32 0.6931472, %v592_v13 }
 0x436   :  { %v367_v14 = vsub.f32 %v360_v9, %v366_v63 }
 0x438   :  { %368 = vst [vmem:[#allocation5] sm:$0xff] %v367_v14 }
 0x439   :  { %626 = shalt.err (!%p623_p12)
}
 0x43a   :  { %s627_s28 = scalar_lea.hbm %s721_s2, 128 }
 0x43b   :  { %p628_p13 = scmp.ne.s32.totalorder %s721_s2, %s627_s28  ;;  %p631_p0 = scmp.lt.u32.totalorder %s627_s28, %s721_s2 }
 0x43d   :  { %p633_p1 = pnand %p631_p0, %p628_p13 }
 0x43f   :  { %636 = shalt.err (!%p633_p1)
}
 0x440   :  { %378 = dma.vmem_to_hbm [thread:$0]  %s376_s24, 128, %s721_s2, [#allocation4]  }
 0x441   :  { %639 = dma.done.wait [#allocation4], 128  }
 0x442   :  { %640 = vsyncadd [#allocation4], 4294967168 }
 0x443   :  { %382 = vsyncpa [#allocation3], 1 }
 0x444   :  { %383 = vsyncpa [#allocation4], 1 }

</bundles_post_ra>
